<compile_context>
chip_gen: v7x
topology: tpu7x:2x2x1
jax: 0.10.0
libtpu: 0.0.40
codegen_flags: <defaults>
</compile_context>

<pallas_src>
import functools

import jax
import jax.numpy as jnp
from jax import lax
from jax.experimental import pallas as pl
from jax.experimental.pallas import tpu as pltpu


_INV_SQRT2 = 0.7071067811865476


def _round_up(x, m):
    return (x + m - 1) // m * m


def _gelu_exact_f32(h):
    # exact erf GELU in f32 (matches torch.nn.GELU default).
    # (tanh-approx GELU would move work VPU->EUP; only worth it if VALU-bound.)
    return 0.5 * h * (1.0 + lax.erf(h * jnp.float32(_INV_SQRT2)))


# ----------------------------------------------------------------------------- kernels
def _mlp_kernel_single(x_ref, w1_ref, b1_ref, w2_ref, b2_ref, o_ref):
    """One token-tile grid step of fc2(GELU(fc1(x))), whole mlp_dim in one chunk.

    x_ref : (TN, Dp)   token tile
    w1_ref: (Dp, Mp)   fc1 weight (stored transposed: x @ W1)
    b1_ref: (1,  Mp)   fc1 bias
    w2_ref: (Mp, Dp)   fc2 weight
    b2_ref: (1,  Dp)   fc2 bias
    o_ref : (TN, Dp)   output tile
    """
    x = x_ref[...]
    h = jnp.dot(x, w1_ref[...], preferred_element_type=jnp.float32)
    h = _gelu_exact_f32(h + b1_ref[...].astype(jnp.float32))
    # dropout p=0.0 -> identity
    out = jnp.dot(h.astype(x.dtype), w2_ref[...], preferred_element_type=jnp.float32)
    o_ref[...] = (out + b2_ref[...].astype(jnp.float32)).astype(o_ref.dtype)


def _mlp_kernel_chunked(x_ref, w1_ref, b1_ref, w2_ref, b2_ref, o_ref, acc_ref):
    """One (token-tile, M-chunk) grid step of fc2(GELU(fc1(x))).

    Same shapes as above except the M dimension is a chunk of size TM, and
    acc_ref is a (TN, Dp) f32 VMEM accumulator over M-chunks.
    """
    m_idx = pl.program_id(1)

    @pl.when(m_idx == 0)
    def _():
        acc_ref[...] = jnp.zeros_like(acc_ref)

    x = x_ref[...]
    h = jnp.dot(x, w1_ref[...], preferred_element_type=jnp.float32)
    h = _gelu_exact_f32(h + b1_ref[...].astype(jnp.float32))
    # dropout p=0.0 -> identity; fc2 partial product accumulated over M-chunks in f32.
    acc_ref[...] += jnp.dot(h.astype(x.dtype), w2_ref[...],
                            preferred_element_type=jnp.float32)

    @pl.when(m_idx == pl.num_programs(1) - 1)
    def _():
        o_ref[...] = (acc_ref[...] + b2_ref[...].astype(jnp.float32)).astype(o_ref.dtype)


# ------------------------------------------------------------- Buffered(1) capability
_BUFFERED1_OK = None


def _buffered1_supported():
    """Probe (once) whether pipeline_mode=pl.Buffered(1) lowers on this jax/TPU."""
    global _BUFFERED1_OK
    if _BUFFERED1_OK is None:
        try:
            def _k(x_ref, w_ref, o_ref):
                o_ref[...] = x_ref[...] + w_ref[...]

            f = pl.pallas_call(
                _k,
                out_shape=jax.ShapeDtypeStruct((16, 128), jnp.float32),
                grid=(2,),
                in_specs=[
                    pl.BlockSpec((8, 128), lambda i: (i, 0)),
                    pl.BlockSpec((8, 128), lambda i: (0, 0),
                                 pipeline_mode=pl.Buffered(1)),
                ],
                out_specs=pl.BlockSpec((8, 128), lambda i: (i, 0)),
            )
            jax.block_until_ready(
                f(jnp.zeros((16, 128), jnp.float32),
                  jnp.zeros((8, 128), jnp.float32)))
            _BUFFERED1_OK = True
        except Exception:  # fall back to default double-buffering
            _BUFFERED1_OK = False
    return _BUFFERED1_OK


# ---------------------------------------------------------------------------- wrapper
@functools.partial(
    jax.jit,
    static_argnames=("block_tokens", "block_m", "d_pad", "m_pad",
                     "single_w", "single_b2"))
def _mlp_block_impl(x, w1, b1, w2, b2, *, block_tokens, block_m,
                    d_pad, m_pad, single_w, single_b2):
    B, S, D = x.shape
    M = w1.shape[1]
    N = B * S
    n_pad = _round_up(N, block_tokens)

    # Pad to tile-aligned, lane-dense shapes (zeros are exact no-ops for the math).
    x2 = x.reshape(N, D)
    if n_pad != N or d_pad != D:
        x2 = jnp.pad(x2, ((0, n_pad - N), (0, d_pad - D)))
    w1p = jnp.pad(w1, ((0, d_pad - D), (0, m_pad - M))) if (d_pad != D or m_pad != M) else w1
    w2p = jnp.pad(w2, ((0, m_pad - M), (0, d_pad - D))) if (d_pad != D or m_pad != M) else w2
    b1p = (jnp.pad(b1, (0, m_pad - M)) if m_pad != M else b1).reshape(1, m_pad)
    b2p = (jnp.pad(b2, (0, d_pad - D)) if d_pad != D else b2).reshape(1, d_pad)

    n_tiles = n_pad // block_tokens
    m_chunks = m_pad // block_m

    def _spec(shape, index_map, single):
        if single:
            # Grid-invariant operand: keep it resident with a single VMEM buffer.
            return pl.BlockSpec(shape, index_map, pipeline_mode=pl.Buffered(1))
        return pl.BlockSpec(shape, index_map)

    # Explicit VMEM budget instead of the 32 MiB scoped default (headroom included,
    # capped by physical VMEM so it is valid on v7x's 64 MiB as well as v5e/v6e).
    itemsize = jnp.dtype(x.dtype).itemsize
    wbuf = 1 if single_w else 2
    est = (
        4 * block_tokens * d_pad * itemsize                       # x + out, double-buffered
        + wbuf * 2 * d_pad * block_m * itemsize                   # w1 + w2
        + 2 * (block_m + d_pad) * itemsize                        # biases
        + 2 * block_tokens * block_m * 4                          # fc1/GELU f32 intermediate
    )
    if m_chunks > 1:
        est += block_tokens * d_pad * 4                           # f32 accumulator scratch
    try:
        vmem_cap = int(pltpu.get_tpu_info().vmem_capacity_bytes)
    except Exception:
        vmem_cap = 64 << 20  # conservative (v7x per-TensorCore)
    vmem_limit = int(min(max(est * 5 // 4 + (4 << 20), 32 << 20), (vmem_cap * 9) // 10))

    if m_chunks == 1:
        # Common ViT case: whole mlp_dim in one chunk -> no accumulator scratch,
        # weights grid-invariant across the token grid (constant index_map => no re-DMA).
        grid_spec = pltpu.PrefetchScalarGridSpec(
            num_scalar_prefetch=0,
            grid=(n_tiles,),
            in_specs=[
                pl.BlockSpec((block_tokens, d_pad), lambda i: (i, 0)),    # x tile
                _spec((d_pad, block_m), lambda i: (0, 0), single_w),      # w1
                _spec((1, block_m),     lambda i: (0, 0), single_w),      # b1
                _spec((block_m, d_pad), lambda i: (0, 0), single_w),      # w2
                _spec((1, d_pad),       lambda i: (0, 0), single_b2),     # b2
            ],
            out_specs=pl.BlockSpec((block_tokens, d_pad), lambda i: (i, 0)),
        )
        kernel = _mlp_kernel_single
        dim_sem = ("parallel",)
    else:
        grid_spec = pltpu.PrefetchScalarGridSpec(
            num_scalar_prefetch=0,
            grid=(n_tiles, m_chunks),                     # reduction (M) axis last
            in_specs=[
                pl.BlockSpec((block_tokens, d_pad), lambda i, m: (i, 0)),   # x tile
                pl.BlockSpec((d_pad, block_m),      lambda i, m: (0, m)),   # w1 chunk
                pl.BlockSpec((1, block_m),          lambda i, m: (0, m)),   # b1 chunk
                pl.BlockSpec((block_m, d_pad),      lambda i, m: (m, 0)),   # w2 chunk
                _spec((1, d_pad),                   lambda i, m: (0, 0), single_b2),  # b2
            ],
            out_specs=pl.BlockSpec((block_tokens, d_pad), lambda i, m: (i, 0)),
            scratch_shapes=[pltpu.VMEM((block_tokens, d_pad), jnp.float32)],
        )
        kernel = _mlp_kernel_chunked
        dim_sem = ("parallel", "arbitrary")

    out = pl.pallas_call(
        kernel,
        out_shape=jax.ShapeDtypeStruct((n_pad, d_pad), x.dtype),
        grid_spec=grid_spec,
        compiler_params=pltpu.CompilerParams(
            dimension_semantics=dim_sem,
            vmem_limit_bytes=vmem_limit,
        ),
    )(x2, w1p, b1p, w2p, b2p)

    return out[:N, :D].reshape(B, S, D)


def mlp_block(x, w1, b1, w2, b2, *, block_tokens=256, block_m=None):
    """ViT MLPBlock forward: fc2(GELU(fc1(x))), dropout=0.0.

    x : (B, S, D); w1: (D, M); b1: (M,); w2: (M, D); b2: (D,).
    Weights are stored transposed relative to torch.nn.Linear (.weight.T).
    Inputs may be f32 or bf16; matmuls always accumulate in f32 (bf16 inputs feed the
    MXU at full rate; for v7x, fp8 weights could be substituted if accuracy allows).
    """
    B, S, D = x.shape
    M = w1.shape[1]
    N = B * S

    # Token tile: multiple of 16 (safe for f32 and bf16 sublane packing), 128-aligned
    # by default (good for the v5e 4x128^2 and v6e/v7x 2x256^2 MXUs).
    token_align = 16
    bt = min(int(block_tokens), _round_up(N, token_align))
    bt = max(token_align, _round_up(bt, token_align))

    d_pad = _round_up(D, 128)          # lane-dense output / contraction dims
    m128 = _round_up(M, 128)
    if block_m is None:
        # Cap the (bt, block_m) f32 GELU intermediate at ~8 MiB so huge mlp_dim
        # still fits the v7x 64 MiB VMEM at a healthy token tile.
        cap = max(128, ((8 << 20) // (bt * 4)) // 128 * 128)
        bm = min(m128, cap)
    else:
        bm = min(_round_up(int(block_m), 128), m128)
    m_pad = _round_up(M, bm)

    buffered1 = _buffered1_supported()
    single_w = buffered1 and (m_pad == bm)   # weights grid-invariant only if one M chunk
    single_b2 = buffered1                    # b2 is always grid-invariant

    return _mlp_block_impl(
        x, w1, b1, w2, b2,
        block_tokens=bt, block_m=bm, d_pad=d_pad, m_pad=m_pad,
        single_w=single_w, single_b2=single_b2)


# -------------------------------------------------------------------------- reference
def _reference_mlp(x, w1, b1, w2, b2):
    h = jnp.einsum("bsd,dm->bsm", x, w1, precision=lax.Precision.HIGHEST) + b1
    h = jax.nn.gelu(h, approximate=False)
    return jnp.einsum("bsm,md->bsd", h, w2, precision=lax.Precision.HIGHEST) + b2


if __name__ == "__main__":
    # Test 1: small shapes consistent with MLPBlock(embedding_dim=32, mlp_dim=64).
    B, S, D, M = 2, 8, 32, 64
    key = jax.random.PRNGKey(0)
    kx, kw1, kb1, kw2, kb2 = jax.random.split(key, 5)

    x = jax.random.normal(kx, (B, S, D), dtype=jnp.float32)
    w1 = jax.random.normal(kw1, (D, M), dtype=jnp.float32) * (1.0 / jnp.sqrt(D))
    b1 = jax.random.normal(kb1, (M,), dtype=jnp.float32) * 0.01
    w2 = jax.random.normal(kw2, (M, D), dtype=jnp.float32) * (1.0 / jnp.sqrt(M))
    b2 = jax.random.normal(kb2, (D,), dtype=jnp.float32) * 0.01

    out = jax.block_until_ready(mlp_block(x, w1, b1, w2, b2))
    ref = _reference_mlp(x, w1, b1, w2, b2)
    assert out.shape == (B, S, D)
    assert jnp.allclose(out, ref, atol=1e-4, rtol=1e-4), "f32 mismatch vs reference"

    # Test 2: ragged token count + multi-step token grid + chunked-M accumulator path.
    B2, S2, D2, M2 = 3, 100, 192, 384
    k2 = jax.random.split(jax.random.PRNGKey(0), 5)
    x_2 = jax.random.normal(k2[0], (B2, S2, D2), dtype=jnp.float32)
    w1_2 = jax.random.normal(k2[1], (D2, M2), dtype=jnp.float32) * (1.0 / jnp.sqrt(D2))
    b1_2 = jax.random.normal(k2[2], (M2,), dtype=jnp.float32) * 0.01
    w2_2 = jax.random.normal(k2[3], (M2, D2), dtype=jnp.float32) * (1.0 / jnp.sqrt(M2))
    b2_2 = jax.random.normal(k2[4], (D2,), dtype=jnp.float32) * 0.01
    out2 = jax.block_until_ready(
        mlp_block(x_2, w1_2, b1_2, w2_2, b2_2, block_tokens=128, block_m=128))
    ref2 = _reference_mlp(x_2, w1_2, b1_2, w2_2, b2_2)
    assert out2.shape == (B2, S2, D2)
    assert jnp.allclose(out2, ref2, atol=1e-3, rtol=1e-3), "tiled f32 mismatch vs reference"

    # Test 3: bf16 inputs (MXU-friendly path); bf16 rounding -> loose tolerance vs f32 ref.
    out_bf16 = jax.block_until_ready(mlp_block(
        x.astype(jnp.bfloat16), w1.astype(jnp.bfloat16), b1.astype(jnp.bfloat16),
        w2.astype(jnp.bfloat16), b2.astype(jnp.bfloat16)))
    assert out_bf16.dtype == jnp.bfloat16
    assert float(jnp.max(jnp.abs(out_bf16.astype(jnp.float32) - ref))) < 0.1, "bf16 mismatch"

    # TODO(synk): non-zero dropout (module default is 0.0) would need pltpu.prng_seed /
    # prng_random_bits inside the kernel; not implemented since p=0.0 is an identity.
    print("KERNEL_OK")
</pallas_src>

<mosaic_0001>
module attributes {stable_mosaic.version = 11 : i64} {
  func.func @_k(%arg0: i32, %arg1: memref<8x128xf32, #tpu.memory_space<vmem>>, %arg2: memref<8x128xf32, #tpu.memory_space<vmem>>, %arg3: memref<8x128xf32, #tpu.memory_space<vmem>>) attributes {dimension_semantics = [#tpu.dimension_semantics<arbitrary>], iteration_bounds = array<i64: 2>, scalar_prefetch = 0 : i64, scratch_operands = 0 : i64, tpu.core_type = #tpu.core_type<tc>, window_params = [{transform_indices = @transform_0, window_bounds = array<i64: 8, 128>}, {pipeline_mode = #tpu.pipeline_mode<synchronous>, transform_indices = @transform_1, window_bounds = array<i64: 8, 128>}, {transform_indices = @transform_2, window_bounds = array<i64: 8, 128>}]} {
    %c0 = arith.constant 0 : index
    %c0_0 = arith.constant 0 : index
    %0 = vector.load %arg1[%c0, %c0_0] : memref<8x128xf32, #tpu.memory_space<vmem>>, vector<8x128xf32>
    %c0_1 = arith.constant 0 : index
    %c0_2 = arith.constant 0 : index
    %1 = vector.load %arg2[%c0_1, %c0_2] : memref<8x128xf32, #tpu.memory_space<vmem>>, vector<8x128xf32>
    %2 = arith.addf %0, %1 : vector<8x128xf32>
    %c0_3 = arith.constant 0 : index
    %c0_4 = arith.constant 0 : index
    %3 = vector.load %arg3[%c0_3, %c0_4] : memref<8x128xf32, #tpu.memory_space<vmem>>, vector<8x128xf32>
    tpu.vector_store %arg3[%c0_3, %c0_4], %2 {strides = array<i32>} : memref<8x128xf32, #tpu.memory_space<vmem>>, vector<8x128xf32>,
    return
  }
  func.func @transform_0(%arg0: i32) -> (i32, i32) {
    %c0_i32 = arith.constant 0 : i32
    %c0_i32_0 = arith.constant 0 : i32
    return %arg0, %c0_i32 : i32, i32
  }
  func.func @transform_1(%arg0: i32) -> (i32, i32) {
    %c0_i32 = arith.constant 0 : i32
    %c0_i32_0 = arith.constant 0 : i32
    %c0_i32_1 = arith.constant 0 : i32
    return %c0_i32, %c0_i32_0 : i32, i32
  }
  func.func @transform_2(%arg0: i32) -> (i32, i32) {
    %c0_i32 = arith.constant 0 : i32
    %c0_i32_0 = arith.constant 0 : i32
    return %arg0, %c0_i32 : i32, i32
  }
}

module attributes {stable_mosaic.version = 11 : i64} {
  func.func @_mlp_kernel_single(%arg0: i32, %arg1: memref<16x128xf32, #tpu.memory_space<vmem>>, %arg2: memref<128x128xf32, #tpu.memory_space<vmem>>, %arg3: memref<1x128xf32, #tpu.memory_space<vmem>>, %arg4: memref<128x128xf32, #tpu.memory_space<vmem>>, %arg5: memref<1x128xf32, #tpu.memory_space<vmem>>, %arg6: memref<16x128xf32, #tpu.memory_space<vmem>>) attributes {dimension_semantics = [#tpu.dimension_semantics<parallel>], iteration_bounds = array<i64: 1>, scalar_prefetch = 0 : i64, scratch_operands = 0 : i64, tpu.core_type = #tpu.core_type<tc>, window_params = [{transform_indices = @transform_0, window_bounds = array<i64: 16, 128>}, {pipeline_mode = #tpu.pipeline_mode<synchronous>, transform_indices = @transform_1, window_bounds = array<i64: 128, 128>}, {pipeline_mode = #tpu.pipeline_mode<synchronous>, transform_indices = @transform_2, window_bounds = array<i64: 1, 128>}, {pipeline_mode = #tpu.pipeline_mode<synchronous>, transform_indices = @transform_3, window_bounds = array<i64: 128, 128>}, {pipeline_mode = #tpu.pipeline_mode<synchronous>, transform_indices = @transform_4, window_bounds = array<i64: 1, 128>}, {transform_indices = @transform_5, window_bounds = array<i64: 16, 128>}]} {
    %c0 = arith.constant 0 : index
    %c0_0 = arith.constant 0 : index
    %0 = vector.load %arg1[%c0, %c0_0] : memref<16x128xf32, #tpu.memory_space<vmem>>, vector<16x128xf32>
    %c0_1 = arith.constant 0 : index
    %c0_2 = arith.constant 0 : index
    %1 = vector.load %arg2[%c0_1, %c0_2] : memref<128x128xf32, #tpu.memory_space<vmem>>, vector<128x128xf32>
    %cst = arith.constant dense<0.000000e+00> : vector<16x128xf32>
    %2 = tpu.matmul %0, %1, %cst {dimension_numbers = #tpu.dot_dimension_numbers<[1], [0], [0], [1], [0, 0, 1, 1], [], []>} : vector<16x128xf32>, vector<128x128xf32>, vector<16x128xf32> -> vector<16x128xf32>
    %c0_3 = arith.constant 0 : index
    %c0_4 = arith.constant 0 : index
    %3 = vector.load %arg3[%c0_3, %c0_4] : memref<1x128xf32, #tpu.memory_space<vmem>>, vector<1x128xf32>
    %4 = vector.broadcast %3 : vector<1x128xf32> to vector<16x128xf32>
    %5 = arith.addf %2, %4 : vector<16x128xf32>
    %cst_5 = arith.constant 5.000000e-01 : f32
    %6 = vector.broadcast %cst_5 : f32 to vector<16x128xf32>
    %7 = arith.mulf %6, %5 : vector<16x128xf32>
    %cst_6 = arith.constant 0.707106769 : f32
    %8 = vector.broadcast %cst_6 : f32 to vector<16x128xf32>
    %9 = arith.mulf %5, %8 : vector<16x128xf32>
    %10 = math.erf %9 : vector<16x128xf32>
    %cst_7 = arith.constant 1.000000e+00 : f32
    %11 = vector.broadcast %cst_7 : f32 to vector<16x128xf32>
    %12 = arith.addf %11, %10 : vector<16x128xf32>
    %13 = arith.mulf %7, %12 : vector<16x128xf32>
    %c0_8 = arith.constant 0 : index
    %c0_9 = arith.constant 0 : index
    %14 = vector.load %arg4[%c0_8, %c0_9] : memref<128x128xf32, #tpu.memory_space<vmem>>, vector<128x128xf32>
    %cst_10 = arith.constant dense<0.000000e+00> : vector<16x128xf32>
    %15 = tpu.matmul %13, %14, %cst_10 {dimension_numbers = #tpu.dot_dimension_numbers<[1], [0], [0], [1], [0, 0, 1, 1], [], []>} : vector<16x128xf32>, vector<128x128xf32>, vector<16x128xf32> -> vector<16x128xf32>
    %c0_11 = arith.constant 0 : index
    %c0_12 = arith.constant 0 : index
    %16 = vector.load %arg5[%c0_11, %c0_12] : memref<1x128xf32, #tpu.memory_space<vmem>>, vector<1x128xf32>
    %17 = vector.broadcast %16 : vector<1x128xf32> to vector<16x128xf32>
    %18 = arith.addf %15, %17 : vector<16x128xf32>
    %c0_13 = arith.constant 0 : index
    %c0_14 = arith.constant 0 : index
    %19 = vector.load %arg6[%c0_13, %c0_14] : memref<16x128xf32, #tpu.memory_space<vmem>>, vector<16x128xf32>
    tpu.vector_store %arg6[%c0_13, %c0_14], %18 {strides = array<i32>} : memref<16x128xf32, #tpu.memory_space<vmem>>, vector<16x128xf32>,
    return
  }
  func.func @transform_0(%arg0: i32) -> (i32, i32) {
    %c0_i32 = arith.constant 0 : i32
    %c0_i32_0 = arith.constant 0 : i32
    return %arg0, %c0_i32 : i32, i32
  }
  func.func @transform_1(%arg0: i32) -> (i32, i32) {
    %c0_i32 = arith.constant 0 : i32
    %c0_i32_0 = arith.constant 0 : i32
    %c0_i32_1 = arith.constant 0 : i32
    return %c0_i32, %c0_i32_0 : i32, i32
  }
  func.func @transform_2(%arg0: i32) -> (i32, i32) {
    %c0_i32 = arith.constant 0 : i32
    %c0_i32_0 = arith.constant 0 : i32
    %c0_i32_1 = arith.constant 0 : i32
    return %c0_i32, %c0_i32_0 : i32, i32
  }
  func.func @transform_3(%arg0: i32) -> (i32, i32) {
    %c0_i32 = arith.constant 0 : i32
    %c0_i32_0 = arith.constant 0 : i32
    %c0_i32_1 = arith.constant 0 : i32
    return %c0_i32, %c0_i32_0 : i32, i32
  }
  func.func @transform_4(%arg0: i32) -> (i32, i32) {
    %c0_i32 = arith.constant 0 : i32
    %c0_i32_0 = arith.constant 0 : i32
    %c0_i32_1 = arith.constant 0 : i32
    return %c0_i32, %c0_i32_0 : i32, i32
  }
  func.func @transform_5(%arg0: i32) -> (i32, i32) {
    %c0_i32 = arith.constant 0 : i32
    %c0_i32_0 = arith.constant 0 : i32
    return %arg0, %c0_i32 : i32, i32
  }
}

</mosaic_0001>

<bundles_post_ra>
// kernel: tpu_custom_call.1
= control target key start
LH: loop header
LB: loop body
LE: loop exit
PB: predicated region body
PF: predicated region fallthrough
CT: control target
= control target key end

     0   :  { %7 = vsyncpa [#allocation3], 0  ;;  %s690_s0 = inlined_call_operand.hbm [shape: f32[16,128], index: 0, kind: input, shape index: {}]   ;;  %s691_s1 = inlined_call_operand.hbm [shape: f32[8,128], index: 1, kind: input, shape index: {}]   ;;  %s692_s2 = inlined_call_operand.hbm [shape: f32[16,128], index: 2, kind: output, shape index: {}]  }
   0x1   :  { %9 = vsyncpa [#allocation3 + $0x1], 0 }
   0x2   :  { %10 = vsyncpa [#allocation6], 0 }
   0x3   :  { %11 = vsyncpa [#allocation4], 0 }
   0x4   :  { %13 = vsyncpa [#allocation4 + $0x1], 0  ;;  %s489_s9 = smov 0   ;;  %s491_s10 = smov 0  }
   0x5   :  { %s493_s11 = smov 0   ;;  %s495_s12 = smov 0  }
   0x6 LB: > { %s510_s13 = sadd.s32 4294967295, %s469_s12   ;;  %s270_s14 = sadd.s32 4294967294, %s469_s12   ;;  %s469_s12 = sphi %s495_s12, %s716_s12   ;;  %s465_s11 = sphi %s493_s11, %s715_s11   ;;  %s461_s10 = sphi %s491_s10, %s714_s10   ;;  %s457_s9 = sphi %s489_s9, %s713_s9  }
   0x7   : > { %p39_p0 = scmp.ne.s32.totalorder %s461_s10, %s457_s9  ;;  %p693_p1 = scmp.eq.s32.totalorder %s510_s13, 0 }
   0x8   : > { %p90_p3 = scmp.eq.s32.totalorder %s270_s14, 1  ;;  %p271_p5 = scmp.ge.s32.totalorder %s469_s12, 1 }
   0x9   : > { %p519_p4 = por %p693_p1, %p39_p0  ;;  %p97_p7 = scmp.lt.s32.totalorder %s469_s12, 3 }
   0xa   : > { %p524_p6 = por %p90_p3, %p39_p0  ;;  %s471_s18 = smov [#allocation5]  }
   0xb   : > { %s696_s15 = scalar_select %p519_p4, 1, 0 }
   0xc   : > { %s697_s16 = scalar_select %p524_p6, 1, 0 }
   0xd   : > { %p529_p8 = pnand %p271_p5, %p97_p7  ;;  %s110_s19 = sshll.u32 %s471_s18, 4  ;;  %s111_s19 = int_to_ptr.vmem [resolvable:$true] %s110_s19 }
   0xe   : > { %s537_s20 = sadd.s32 1, %s469_s12   ;;  %s26_s24 = sadd.s32 1, %s465_s11 }
   0xf   : > { %s698_s17 = scalar_select %p529_p8, 1, 0 }
  0x10   : > { %p292_p10 = pneg %p529_p8  ;;  %s23_s22 = ssub.s32 %s469_s12, %s537_s20 }
  0x11   : > { %p547_p12 = scmp.eq.s32.totalorder %s23_s22, 0  ;;  %s341_s27 = scalar_lea.hbm %s691_s1, 128 }
  0x12   : > { %p541_p11 = pnand %p292_p10, %p693_p1  ;;  %p342_p0 = scmp.ne.s32.totalorder %s691_s1, %s341_s27 }
  0x13   : > { %s700_s23 = scalar_select %p547_p12, 1, 0 }
  0x14   : > { %p343_p3 = pneg %p541_p11  ;;  %p348_p10 = scmp.lt.u32.totalorder %s341_s27, %s691_s1 }
  0x16   : > { %p344_p5 = pnand %p343_p3, %p342_p0 }
  0x18   : > { %p345_p7 = pneg %p344_p5 }
  0x1a   : > { %p350_p9 = pnand %p348_p10, %p345_p7 }
  0x1c   : > { %353 = shalt.err (!%p350_p9)
}
  0x1d   : > { %s354_s4 = scalar_lea.vmem %s111_s19, 128  ;;  %p362_p6 = scmp.lt.s32.totalorder %s111_s19, %s111_s19 }
  0x1e   : > { %p355_p1 = scmp.ne.s32.totalorder %s111_s19, %s354_s4  ;;  %p363_p4 = scmp.lt.s32.totalorder %s354_s4, %s354_s4 }
  0x20   : > { %p357_p2 = pnand %p355_p1, %p343_p3  ;;  %p364_p8 = por %p363_p4, %p362_p6 }
  0x22   : > { %p358_p13 = pneg %p357_p2 }
  0x24   : > { %p365_p12 = pnand %p364_p8, %p358_p13 }
  0x26   : > { %368 = shalt.err (!%p365_p12)
}
  0x27   : > { %295 = dma.hbm_to_vmem [thread:$0]  (!%p541_p11), %s691_s1, 128, %s111_s19, [#allocation6]  }
  0x28   : > { %p701_p1 = scmp.ne.s32.totalorder %s700_s23, 0  ;;  %p34_p2 = scmp.eq.s32.totalorder %s469_s12, 0 }
  0x29   : > { %p702_p4 = scmp.ne.s32.totalorder %s465_s11, %s461_s10  ;;  %p703_p6 = scmp.eq.s32.totalorder %s510_s13, 1 }
  0x2a   : > { %s573_s7 = scalar_select %p701_p1, %s465_s11, %s26_s24  }
  0x2b   : > { %p581_p8 = por %p703_p6, %p702_p4  ;;  %p305_p9 = scmp.lt.s32.totalorder %s469_s12, 2 }
  0x2c   : > { %s121_s14 = sand.u32 1, %s465_s11   ;;  %p705_p12 = pmov %p702_p4 }
  0x2d   : > { %s274_s18 = sshll.u32 %s121_s14, 3  ;;  %s275_s21 = sshll.u32 %s469_s12, 7 }
  0x2e   : > { %p35_p13 = por %p34_p2, %p705_p12  ;;  %s594_s19 = scalar_lea.hbm %s690_s0, %s275_s21 }
  0x2f   : > { %s125_s23 = scalar_lea.vmem [#allocation2], %s274_s18  ;;  %s122_s27 = scalar_lea.sflag [#allocation3], %s121_s14 }
  0x30   : > { %s132_s24 = sshll.u32 %s125_s23, 4  ;;  %p596_p11 = pnand %p305_p9, %p35_p13  ;;  %s600_s24 = int_to_ptr.vmem [resolvable:$true] %s132_s24 }
  0x31   : > { %s369_s28 = scalar_lea.hbm %s594_s19, 128  ;;  %s374_s3 = scalar_lea.hbm %s690_s0, 256 }
  0x32   : > { %p370_p0 = scmp.ne.s32.totalorder %s594_s19, %s369_s28  ;;  %p371_p3 = pneg %p596_p11 }
  0x33   : > { %p375_p10 = scmp.lt.u32.totalorder %s594_s19, %s690_s0  ;;  %p376_p1 = scmp.lt.u32.totalorder %s374_s3, %s369_s28 }
  0x34   : > { %p372_p5 = pnand %p371_p3, %p370_p0  ;;  %p378_p4 = scmp.lt.u32.totalorder %s369_s28, %s594_s19 }
  0x35   : > { %p377_p2 = por %p376_p1, %p375_p10 }
  0x36   : > { %p373_p7 = pneg %p372_p5 }
  0x37   : > { %p379_p6 = por %p378_p4, %p377_p2 }
  0x39   : > { %p380_p9 = pnand %p379_p6, %p373_p7 }
  0x3b   : > { %383 = shalt.err (!%p380_p9)
}
  0x3c   : > { %s384_s6 = scalar_lea.vmem %s600_s24, 128  ;;  %s472_s14 = smov [#allocation2]  }
  0x3d   : > { %p385_p12 = scmp.ne.s32.totalorder %s600_s24, %s384_s6  ;;  %s389_s18 = sshll.u32 %s472_s14, 4  ;;  %s390_s18 = int_to_ptr.vmem [resolvable:$false] %s389_s18 }
  0x3e   : > { %s391_s21 = scalar_lea.vmem %s390_s18, 256  ;;  %p392_p5 = scmp.lt.s32.totalorder %s600_s24, %s390_s18 }
  0x3f   : > { %p387_p13 = pnand %p385_p12, %p371_p3  ;;  %p393_p10 = scmp.lt.s32.totalorder %s391_s21, %s384_s6 }
  0x41   : > { %p388_p0 = pneg %p387_p13  ;;  %p394_p1 = por %p393_p10, %p392_p5 }
  0x43   : > { %p395_p2 = pnand %p394_p1, %p388_p0 }
  0x45   : > { %398 = shalt.err (!%p395_p2)
}
  0x46   : > { %299 = dma.hbm_to_vmem [thread:$0]  (!%p596_p11), %s594_s19, 128, %s600_s24, %s122_s27  }
  0x47   : > { %p707_p7 = scmp.ne.s32.totalorder %s698_s17, 0 }
  0x48   : > { %s630_s22 = sand.u32 (!%p707_p7), 1, %s461_s10   ;;  %p708_p3 = scmp.ne.s32.totalorder (!%p707_p7), %s696_s15, 0 }
  0x49   : > { %141 = sbr.rel (%p707_p7) target bundleno = 109 (0x6d), region = 28  ;;  %s277_s25 = sshll.u32 (!%p707_p7), %s630_s22, 3 }
  0x4a   : > { %s144_s23 = scalar_lea.sflag (!%p707_p7), [#allocation3], %s630_s22  ;;  %s147_s28 = scalar_lea.vmem (!%p707_p7), [#allocation2], %s277_s25 }
  0x50   : > { %444 = dma.done.wait (%p708_p3), %s144_s23, 128  }
  0x51   : > { %446 = vsyncadd (%p708_p3), %s144_s23, 4294967168  ;;  %p709_p4 = scmp.eq.s32.totalorder %s510_s13, 0 }
  0x53   : > { %448 = dma.done.wait (%p709_p4), [#allocation6], 128   ;;  %p710_p11 = pmov %p709_p4 }
  0x54   : > { %s171_s17 = scalar_lea.vmem [#allocation7], %s277_s25  ;;  %s281_s24 = sshll.u32 %s510_s13, 7  ;;  %v172_v0 = vld [vmem:[%s147_s28] sm:$0xff]  ;;  %v173_v1 = vld [vmem:[#allocation5] sm:$0xff] }
  0x55   : > { %450 = vsyncadd (%p710_p11), [#allocation6], 4294967168  ;;  %s190_s19 = sshll.u32 %s171_s17, 4  ;;  %v174_v2 = vadd.f32 %v173_v1, %v172_v0  ;;  %s648_s27 = scalar_lea.hbm %s692_s2, %s281_s24  ;;  %s643_s19 = int_to_ptr.vmem [resolvable:$true] %s190_s19 }
  0x56   : > { %s177_s29 = scalar_lea.sflag [#allocation4], %s630_s22  ;;  %s399_s30 = scalar_lea.vmem %s643_s19, 128 }
  0x57   : > { %175 = vst [vmem:[%s171_s17] sm:$0xff] %v174_v2  ;;  %p400_p6 = scmp.ne.s32.totalorder %s643_s19, %s399_s30  ;;  %s473_s13 = smov [#allocation7]  }
  0x58   : > { %s403_s3 = sshll.u32 %s473_s13, 4  ;;  %s404_s3 = int_to_ptr.vmem [resolvable:$false] %s403_s3 }
  0x59   : > { %p401_p9 = pnand %p400_p6, %p581_p8  ;;  %s405_s4 = scalar_lea.vmem %s404_s3, 256 }
  0x5a   : > { %p406_p13 = scmp.lt.s32.totalorder %s643_s19, %s404_s3  ;;  %p407_p0 = scmp.lt.s32.totalorder %s405_s4, %s399_s30 }
  0x5b   : > { %p402_p12 = pneg %p401_p9 }
  0x5c   : > { %p408_p5 = por %p407_p0, %p406_p13 }
  0x5e   : > { %p409_p10 = pnand %p408_p5, %p402_p12 }
  0x60   : > { %412 = shalt.err (!%p409_p10)
}
  0x61   : > { %s413_s5 = scalar_lea.hbm %s648_s27, 128  ;;  %s417_s18 = scalar_lea.hbm %s692_s2, 256 }
  0x62   : > { %p414_p1 = scmp.ne.s32.totalorder %s648_s27, %s413_s5  ;;  %p418_p3 = scmp.lt.u32.totalorder %s648_s27, %s692_s2 }
  0x63   : > { %p419_p4 = scmp.lt.u32.totalorder %s417_s18, %s413_s5  ;;  %p421_p6 = scmp.lt.u32.totalorder %s413_s5, %s648_s27 }
  0x64   : > { %p415_p2 = pnand %p414_p1, %p581_p8 }
  0x65   : > { %p420_p11 = por %p419_p4, %p418_p3 }
  0x66   : > { %p416_p7 = pneg %p415_p2 }
  0x67   : > { %p422_p9 = por %p421_p6, %p420_p11 }
  0x69   : > { %p423_p12 = pnand %p422_p9, %p416_p7 }
  0x6b   : > { %426 = shalt.err (!%p423_p12)
}
  0x6c   : > { %290 = dma.vmem_to_hbm [thread:$0]  (%p581_p8), %s643_s19, 128, %s648_s27, %s177_s29  }
  0x6d PF: > { %s202_s25 = sand.u32 1, %s457_s9   ;;  %p711_p13 = scmp.ne.s32.totalorder %s697_s16, 0 }
  0x6e   : > { %p712_p0 = scmp.ge.s32.totalorder %s469_s12, 2  ;;  %s203_s23 = scalar_lea.sflag [#allocation4], %s202_s25 }
  0x70   : > { %p301_p5 = pnand %p712_p0, %p711_p13 }
  0x72   : > { %452 = dma.done.wait (!%p301_p5), %s203_s23, 128  }
  0x73   : > { %454 = vsyncadd (!%p301_p5), %s203_s23, 4294967168  ;;  %p16_p10 = scmp.ge.s32.totalorder %s537_s20, 4   ;;  %s713_s9 = smov %s461_s10 }
  0x74   : > { %s714_s10 = smov %s465_s11  ;;  %s715_s11 = smov %s573_s7 }
  0x75   : > { %s716_s12 = smov %s537_s20  ;;  %18 = sbr.rel (!%p16_p10) target bundleno = 6 (0x6), region = 77 }
  0x7c   :  { %208 = vsyncpa [#allocation3], 1 }
  0x7d   :  { %210 = vsyncpa [#allocation3 + $0x1], 1 }
  0x7e   :  { %211 = vsyncpa [#allocation6], 1 }
  0x7f   :  { %212 = vsyncpa [#allocation4], 1 }
  0x80   :  { %214 = vsyncpa [#allocation4 + $0x1], 1 }

// kernel: _mlp_block_impl.1
= control target key start
LH: loop header
LB: loop body
LE: loop exit
PB: predicated region body
PF: predicated region fallthrough
CT: control target
= control target key end

     0   :  { %s554_s1 = inlined_call_operand.vmem [shape: f32[128,128], index: 1, kind: input, shape index: {}]   ;;  %s555_s0 = inlined_call_operand.vmem [shape: f32[16,128], index: 0, kind: input, shape index: {}]   ;;  %s556_s3 = inlined_call_operand.vmem [shape: f32[128,128], index: 3, kind: input, shape index: {}]   ;;  %s557_s2 = inlined_call_operand.vmem [shape: f32[1,128], index: 2, kind: input, shape index: {}]   ;;  %s558_s4 = inlined_call_operand.vmem [shape: f32[1,128], index: 4, kind: input, shape index: {}]   ;;  %s559_s5 = inlined_call_operand.vmem [shape: f32[16,128], index: 5, kind: output, shape index: {}]  }
   0x1   :  { %v22_v0 = vld [vmem:[%s554_s1] sm:$0xff]  ;;  %v23_v1 = vld [vmem:[%s554_s1 + $0x8] sm:$0xff]  ;;  %v24_v2 = vld [vmem:[%s554_s1 + $0x10] sm:$0xff] }
   0x2   :  { %v342_v3 = vpack.c.bf16 %v23_v1, %v22_v0  ;;  %v25_v4 = vld [vmem:[%s554_s1 + $0x18] sm:$0xff]  ;;  %v26_v6 = vld [vmem:[%s554_s1 + $0x20] sm:$0xff]  ;;  %v27_v7 = vld [vmem:[%s554_s1 + $0x28] sm:$0xff] }
   0x3   :  { %v346_v5 = vpack.c.bf16 %v25_v4, %v24_v2  ;;  %v350_v8 = vpack.c.bf16 %v27_v7, %v26_v6  ;;  %v28_v9 = vld [vmem:[%s554_s1 + $0x30] sm:$0xff]  ;;  %v29_v10 = vld [vmem:[%s554_s1 + $0x38] sm:$0xff]  ;;  %v20_v11 = vld [vmem:[%s555_s0] sm:$0xff] }
   0x4   :  { %343 = vmatprep.subr.bf16.mxu0 %v342_v3  ;;  %304 = vmatprep.mubr.f32.mxu0 %v20_v11  ;;  %v130_v12 = vld [vmem:[%s556_s3] sm:$0xff]  ;;  %v131_v13 = vld [vmem:[%s556_s3 + $0x8] sm:$0xff]  ;;  %v132_v14 = vld [vmem:[%s556_s3 + $0x10] sm:$0xff]  ;;  %v354_v20 = vpack.c.bf16 %v29_v10, %v28_v9 }
   0x5   :  { %345 = vmatpush3.bf16.msra.mxu0 %v342_v3  ;;  %v374_v15 = vpack.c.bf16 %v131_v13, %v130_v12  ;;  %v133_v16 = vld [vmem:[%s556_s3 + $0x18] sm:$0xff]  ;;  %v134_v18 = vld [vmem:[%s556_s3 + $0x20] sm:$0xff]  ;;  %v135_v19 = vld [vmem:[%s556_s3 + $0x28] sm:$0xff] }
   0x6   :  { %347 = vmatprep.subr.bf16.mxu0 %v346_v5  ;;  %v378_v17 = vpack.c.bf16 %v133_v16, %v132_v14  ;;  %v30_v21 = vld [vmem:[%s554_s1 + $0x40] sm:$0xff]  ;;  %v31_v22 = vld [vmem:[%s554_s1 + $0x48] sm:$0xff]  ;;  %v382_v23 = vpack.c.bf16 %v135_v19, %v134_v18  ;;  %v32_v25 = vld [vmem:[%s554_s1 + $0x50] sm:$0xff] }
   0x7   :  { %375 = vmatprep.subr.bf16.mxu1 %v374_v15  ;;  %v358_v24 = vpack.c.bf16 %v31_v22, %v30_v21  ;;  %v33_v26 = vld [vmem:[%s554_s1 + $0x58] sm:$0xff]  ;;  %v34_v28 = vld [vmem:[%s554_s1 + $0x60] sm:$0xff]  ;;  %v35_v29 = vld [vmem:[%s554_s1 + $0x68] sm:$0xff] }
   0x8   :  { %377 = vmatpush3.bf16.msra.mxu1 %v374_v15  ;;  %v362_v27 = vpack.c.bf16 %v33_v26, %v32_v25  ;;  %v366_v30 = vpack.c.bf16 %v35_v29, %v34_v28  ;;  %v36_v31 = vld [vmem:[%s554_s1 + $0x70] sm:$0xff]  ;;  %v37_v32 = vld [vmem:[%s554_s1 + $0x78] sm:$0xff]  ;;  %v21_v34 = vld [vmem:[%s555_s0 + $0x8] sm:$0xff] }
   0x9   :  { %349 = vmatpush3.bf16.msra.mxu0 %v346_v5  ;;  %379 = vmatprep.subr.bf16.mxu1 %v378_v17  ;;  %v370_v33 = vpack.c.bf16 %v37_v32, %v36_v31  ;;  %v136_v35 = vld [vmem:[%s556_s3 + $0x30] sm:$0xff]  ;;  %v137_v36 = vld [vmem:[%s556_s3 + $0x38] sm:$0xff]  ;;  %v138_v38 = vld [vmem:[%s556_s3 + $0x40] sm:$0xff] }
   0xa   :  { %351 = vmatprep.subr.bf16.mxu0 %v350_v8  ;;  %v386_v37 = vpack.c.bf16 %v137_v36, %v136_v35  ;;  %v139_v39 = vld [vmem:[%s556_s3 + $0x48] sm:$0xff]  ;;  %v140_v41 = vld [vmem:[%s556_s3 + $0x50] sm:$0xff]  ;;  %v141_v42 = vld [vmem:[%s556_s3 + $0x58] sm:$0xff] }
   0xb   :  { %v390_v40 = vpack.c.bf16 %v139_v39, %v138_v38  ;;  %v394_v43 = vpack.c.bf16 %v141_v42, %v140_v41  ;;  %v142_v44 = vld [vmem:[%s556_s3 + $0x60] sm:$0xff]  ;;  %v143_v45 = vld [vmem:[%s556_s3 + $0x68] sm:$0xff]  ;;  %v144_v47 = vld [vmem:[%s556_s3 + $0x70] sm:$0xff] }
   0xc   :  { %381 = vmatpush3.bf16.msra.mxu1 %v378_v17  ;;  %v398_v46 = vpack.c.bf16 %v143_v45, %v142_v44  ;;  %v145_v48 = vld [vmem:[%s556_s3 + $0x78] sm:$0xff]  ;;  %v234_v50 = vld [vmem:[%s557_s2] ss:$0 sm:$0xff] }
   0xd   :  { %353 = vmatpush3.bf16.msra.mxu0 %v350_v8  ;;  %383 = vmatprep.subr.bf16.mxu1 %v382_v23  ;;  %v402_v49 = vpack.c.bf16 %v145_v48, %v144_v47  ;;  %v235_v1 = vld [vmem:[%s558_s4] ss:$0 sm:$0xff] }
   0xe   :  { %355 = vmatprep.subr.bf16.mxu0 %v354_v20 }
  0x10   :  { %385 = vmatpush3.bf16.msra.mxu1 %v382_v23 }
  0x11   :  { %357 = vmatpush3.bf16.msra.mxu0 %v354_v20  ;;  %387 = vmatprep.subr.bf16.mxu1 %v386_v37 }
  0x12   :  { %359 = vmatprep.subr.bf16.mxu0 %v358_v24 }
  0x14   :  { %389 = vmatpush3.bf16.msra.mxu1 %v386_v37 }
  0x15   :  { %361 = vmatpush3.bf16.msra.mxu0 %v358_v24  ;;  %391 = vmatprep.subr.bf16.mxu1 %v390_v40 }
  0x16   :  { %363 = vmatprep.subr.bf16.mxu0 %v362_v27 }
  0x18   :  { %393 = vmatpush3.bf16.msra.mxu1 %v390_v40 }
  0x19   :  { %365 = vmatpush3.bf16.msra.mxu0 %v362_v27  ;;  %395 = vmatprep.subr.bf16.mxu1 %v394_v43 }
  0x1a   :  { %367 = vmatprep.subr.bf16.mxu0 %v366_v30 }
  0x1c   :  { %397 = vmatpush3.bf16.msra.mxu1 %v394_v43 }
  0x1d   :  { %369 = vmatpush3.bf16.msra.mxu0 %v366_v30  ;;  %399 = vmatprep.subr.bf16.mxu1 %v398_v46 }
  0x1e   :  { %371 = vmatprep.subr.bf16.mxu0 %v370_v33 }
  0x20   :  { %401 = vmatpush3.bf16.msra.mxu1 %v398_v46 }
  0x21   :  { %373 = vmatpush3.bf16.msra.mxu0 %v370_v33  ;;  %403 = vmatprep.subr.bf16.mxu1 %v402_v49 }
  0x24   :  { %305 = vmatmul.mubr.f32.vlgmr.msra.gmra.mrb[0].mxu0 %v21_v34  ;;  %405 = vmatpush3.bf16.msra.mxu1 %v402_v49 }
  0xf7   :  { %v306_v51 = vpop.f32.mrb[0].mxu0 }
  0xf8   :  { %v117_v52 = vadd.f32 %v306_v51, %v234_v50  ;;  %v111_v53 = vpop.f32.mrb[1].mxu0 }
  0xf9   :  { %v112_v54 = vadd.f32 %v234_v50, %v111_v53 }
  0xfa   :  { %v123_v55 = vmul.f32 0.70710677, %v117_v52  ;;  %v121_v62 = vmul.f32 0.5, %v117_v52 }
  0xfb   :  { %v122_v56 = vmul.f32 0.70710677, %v112_v54  ;;  %v120_v60 = vmul.f32 0.5, %v112_v54 }
  0xfc   :  { %406 = verf.f32 %v123_v55 }
  0xfd   :  { %408 = verf.f32 %v122_v56 }
 0x106   :  { %v407_v57 = vpop.eup %406 }
 0x107   :  { %v409_v58 = vpop.eup %408  ;;  %v127_v59 = vadd.f32 1.0, %v407_v57 }
 0x108   :  { %v126_v61 = vadd.f32 1.0, %v409_v58 }
 0x109   :  { %v129_v0 = vmul.f32 %v127_v59, %v121_v62 }
 0x10a   :  { %v128_v63 = vmul.f32 %v126_v61, %v120_v60 }
 0x10c   :  { %339 = vmatprep.mubr.f32.mxu1 %v128_v63 }
 0x10d   :  { %340 = vmatmul.mubr.f32.vlgmr.msra.gmra.mrb[0].mxu1 %v129_v0 }
 0x1e0   :  { %v341_v2 = vpop.f32.mrb[0].mxu1 }
 0x1e1   :  { %v225_v3 = vadd.f32 %v341_v2, %v235_v1  ;;  %v219_v4 = vpop.f32.mrb[1].mxu1 }
 0x1e2   :  { %v220_v5 = vadd.f32 %v235_v1, %v219_v4 }
 0x1e3   :  { %229 = vst [vmem:[%s559_s5 + $0x8] sm:$0xff] %v225_v3 }
 0x1e4   :  { %228 = vst [vmem:[%s559_s5] sm:$0xff] %v220_v5 }

</bundles_post_ra>
